<compile_context>
chip_gen: v5e
topology: v5e:2x2
jax: 0.10.0
libtpu: 0.0.40
codegen_flags: <defaults>
</compile_context>

<pallas_src>
import functools

import jax
import jax.numpy as jnp
from jax.experimental import pallas as pl
from jax.experimental.pallas import tpu as pltpu

_LANES = 128
_MAX_BLOCK_ROWS = 2048  # (2048, 128) f32 = 1 MiB per tile


def _round_up(x, m):
    return (x + m - 1) // m * m


def _dropout_kernel(rdn_ref, img_ref, cov_ref, out_ref, *, prob):
    # torch.where(rdn > prob, cover_image, image)
    out_ref[...] = jnp.where(
        rdn_ref[...] > jnp.float32(prob), cov_ref[...], img_ref[...]
    )


def dropout_noise(image, cover_image, *, prob=0.5, key=None):
    """Pallas equivalent of Dropout.forward((image, cover_image))."""
    assert image.shape == cover_image.shape
    assert image.dtype == cover_image.dtype
    if key is None:
        key = jax.random.PRNGKey(0)

    orig_shape = image.shape
    total = image.size

    # Lane-dense slab: (rows, 128), rows padded to a multiple of the block rows.
    rows = _round_up(pl.cdiv(total, _LANES), 8)
    block_rows = min(_MAX_BLOCK_ROWS, rows)
    rows = _round_up(rows, block_rows)
    padded = rows * _LANES

    def to_slab(x):
        flat = x.reshape(-1)
        if padded != total:
            flat = jnp.pad(flat, (0, padded - total))
        return flat.reshape(rows, _LANES)

    img2 = to_slab(image)
    cov2 = to_slab(cover_image)
    # Uniform [0, 1) random slab (same distribution as torch.rand).
    rdn = jax.random.uniform(key, (rows, _LANES), dtype=jnp.float32)

    grid = (rows // block_rows,)
    blk = pl.BlockSpec((block_rows, _LANES), lambda i: (i, 0))

    out2 = pl.pallas_call(
        functools.partial(_dropout_kernel, prob=float(prob)),
        out_shape=jax.ShapeDtypeStruct((rows, _LANES), image.dtype),
        grid=grid,
        in_specs=[blk, blk, blk],   # rdn, image, cover_image
        out_specs=blk,
        compiler_params=pltpu.CompilerParams(
            dimension_semantics=("parallel",),
        ),
    )(rdn, img2, cov2)

    return out2.reshape(-1)[:total].reshape(orig_shape)


if __name__ == "__main__":
    root = jax.random.PRNGKey(0)
    k_img, k_cov, k_noise = jax.random.split(root, 3)

    # Small NCHW shapes consistent with the module's forward.
    B, C, H, W = 2, 4, 16, 16
    image = jax.random.normal(k_img, (B, C, H, W), dtype=jnp.float32)
    cover_image = jax.random.normal(k_cov, (B, C, H, W), dtype=jnp.float32)

    out = dropout_noise(image, cover_image, prob=0.5, key=k_noise)
    out = jax.block_until_ready(out)

    # Sanity checks: shape/dtype preserved; every element comes from either
    # image or cover_image at the same position; both sources appear.
    assert out.shape == image.shape and out.dtype == image.dtype
    from_img = out == image
    from_cov = out == cover_image
    assert bool(jnp.all(from_img | from_cov))
    assert bool(jnp.any(from_img)) and bool(jnp.any(from_cov))

    # Reference check against plain jnp.where with the same random slab.
    rows = _round_up(pl.cdiv(image.size, _LANES), 8)
    rdn_ref = jax.random.uniform(k_noise, (rows, _LANES), dtype=jnp.float32)
    rdn_ref = rdn_ref.reshape(-1)[: image.size].reshape(image.shape)
    ref = jnp.where(rdn_ref > 0.5, cover_image, image)
    assert bool(jnp.all(out == ref))

    print("KERNEL_OK")
</pallas_src>

<mosaic_0001>
module attributes {stable_mosaic.version = 11 : i64} {
  func.func @_dropout_kernel(%arg0: i32, %arg1: memref<16x128xf32, #tpu.memory_space<vmem>>, %arg2: memref<16x128xf32, #tpu.memory_space<vmem>>, %arg3: memref<16x128xf32, #tpu.memory_space<vmem>>, %arg4: memref<16x128xf32, #tpu.memory_space<vmem>>) attributes {dimension_semantics = [#tpu.dimension_semantics<parallel>], iteration_bounds = array<i64: 1>, scalar_prefetch = 0 : i64, scratch_operands = 0 : i64, tpu.core_type = #tpu.core_type<tc>, window_params = [{transform_indices = @transform_0, window_bounds = array<i64: 16, 128>}, {transform_indices = @transform_1, window_bounds = array<i64: 16, 128>}, {transform_indices = @transform_2, window_bounds = array<i64: 16, 128>}, {transform_indices = @transform_3, window_bounds = array<i64: 16, 128>}]} {
    %c0 = arith.constant 0 : index
    %c0_0 = arith.constant 0 : index
    %0 = vector.load %arg1[%c0, %c0_0] : memref<16x128xf32, #tpu.memory_space<vmem>>, vector<16x128xf32>
    %cst = arith.constant 5.000000e-01 : f32
    %1 = vector.broadcast %cst : f32 to vector<16x128xf32>
    %2 = arith.cmpf ogt, %0, %1 : vector<16x128xf32>
    %c0_1 = arith.constant 0 : index
    %c0_2 = arith.constant 0 : index
    %3 = vector.load %arg3[%c0_1, %c0_2] : memref<16x128xf32, #tpu.memory_space<vmem>>, vector<16x128xf32>
    %c0_3 = arith.constant 0 : index
    %c0_4 = arith.constant 0 : index
    %4 = vector.load %arg2[%c0_3, %c0_4] : memref<16x128xf32, #tpu.memory_space<vmem>>, vector<16x128xf32>
    %5 = arith.select %2, %3, %4 : vector<16x128xi1>, vector<16x128xf32>
    %c0_5 = arith.constant 0 : index
    %c0_6 = arith.constant 0 : index
    %6 = vector.load %arg4[%c0_5, %c0_6] : memref<16x128xf32, #tpu.memory_space<vmem>>, vector<16x128xf32>
    tpu.vector_store %arg4[%c0_5, %c0_6], %5 {strides = array<i32>} : memref<16x128xf32, #tpu.memory_space<vmem>>, vector<16x128xf32>,
    return
  }
  func.func @transform_0(%arg0: i32) -> (i32, i32) {
    %c0_i32 = arith.constant 0 : i32
    %c0_i32_0 = arith.constant 0 : i32
    return %arg0, %c0_i32 : i32, i32
  }
  func.func @transform_1(%arg0: i32) -> (i32, i32) {
    %c0_i32 = arith.constant 0 : i32
    %c0_i32_0 = arith.constant 0 : i32
    return %arg0, %c0_i32 : i32, i32
  }
  func.func @transform_2(%arg0: i32) -> (i32, i32) {
    %c0_i32 = arith.constant 0 : i32
    %c0_i32_0 = arith.constant 0 : i32
    return %arg0, %c0_i32 : i32, i32
  }
  func.func @transform_3(%arg0: i32) -> (i32, i32) {
    %c0_i32 = arith.constant 0 : i32
    %c0_i32_0 = arith.constant 0 : i32
    return %arg0, %c0_i32 : i32, i32
  }
}

</mosaic_0001>

<bundles_post_ra>
// kernel: tpu_custom_call.1
= control target key start
LH: loop header
LB: loop body
LE: loop exit
PB: predicated region body
PF: predicated region fallthrough
CT: control target
= control target key end

     0   :  { %8 = vsyncpa [#allocation3], 0  ;;  %s252_s0 = inlined_call_operand.hbm [shape: f32[16,128], index: 0, kind: input, shape index: {}]   ;;  %s253_s1 = inlined_call_operand.hbm [shape: f32[16,128], index: 1, kind: input, shape index: {}]   ;;  %s254_s2 = inlined_call_operand.hbm [shape: f32[16,128], index: 2, kind: input, shape index: {}]   ;;  %s255_s3 = inlined_call_operand.hbm [shape: f32[16,128], index: 3, kind: output, shape index: {}]  }
   0x1   :  { %9 = vsyncpa [#allocation6], 0 }
   0x2   :  { %10 = vsyncpa [#allocation4], 0  ;;  %s28_s14 = sshll.u32 %s253_s1, 4  ;;  %s202_s15 = smov [#allocation5]   ;;  %s29_s14 = int_to_ptr.hbm [resolvable:$true] %s28_s14 }
   0x3   :  { %s30_s16 = sshll.u32 %s202_s15, 4  ;;  %s15_s19 = sshll.u32 %s252_s0, 4  ;;  %s31_s16 = int_to_ptr.vmem [resolvable:$true] %s30_s16  ;;  %s16_s19 = int_to_ptr.hbm [resolvable:$true] %s15_s19 }
   0x4   :  { %s203_s20 = smov 128   ;;  %s204_s21 = smov 8  }
   0x5   :  { %36 = dma.hbm_to_vmem [thread:$0]  %s29_s14, 256, %s31_s16, [#allocation6], %s203_s20, %s203_s20, %s204_s21  }
   0x6   :  { %s205_s22 = smov [#allocation2]   ;;  %s41_s1 = sshll.u32 %s254_s2, 4  ;;  %s42_s1 = int_to_ptr.hbm [resolvable:$true] %s41_s1 }
   0x7   :  { %s17_s23 = sshll.u32 %s205_s22, 4  ;;  %s206_s0 = smov [#allocation7]   ;;  %s18_s23 = int_to_ptr.vmem [resolvable:$true] %s17_s23 }
   0x8   :  { %23 = dma.hbm_to_vmem [thread:$0]  %s16_s19, 256, %s18_s23, [#allocation3], %s203_s20, %s203_s20, %s204_s21  }
   0x9   :  { %s43_s26 = sshll.u32 %s206_s0, 4  ;;  %s44_s26 = int_to_ptr.vmem [resolvable:$true] %s43_s26 }
   0xa   :  { %49 = dma.hbm_to_vmem [thread:$0]  %s42_s1, 256, %s44_s26, [#allocation6], %s203_s20, %s203_s20, %s204_s21  }
   0xb   :  { %196 = dma.done.wait [#allocation3], 256  }
   0xc   :  { %197 = vsyncadd [#allocation3], 4294967040 }
   0xd   :  { %198 = dma.done.wait [#allocation6], 512  }
   0xe   :  { %199 = vsyncadd [#allocation6], 4294966784  ;;  %s207_s27 = smov [#allocation8]   ;;  %s80_s30 = sshll.u32 %s255_s3, 4  ;;  %v62_v0 = vld [vmem:[#allocation2] sm:$0xff]  ;;  %v68_v2 = vld [vmem:[#allocation5] sm:$0xff]  ;;  %s81_s30 = int_to_ptr.hbm [resolvable:$true] %s80_s30 }
   0xf   :  { %s78_s28 = sshll.u32 %s207_s27, 4  ;;  %v66_v1 = vld [vmem:[#allocation7] sm:$0xff]  ;;  %vm64_vm0 = vcmp.gt.f32.partialorder %v62_v0, 0.5  ;;  %v63_v3 = vld [vmem:[#allocation2 + $0x8] sm:$0xff]  ;;  %v69_v5 = vld [vmem:[#allocation5 + $0x8] sm:$0xff]  ;;  %s79_s28 = int_to_ptr.vmem [resolvable:$true] %s78_s28 }
  0x10   :  { %v67_v4 = vld [vmem:[#allocation7 + $0x8] sm:$0xff]  ;;  %v70_v6 = vsel %vm64_vm0, %v66_v1, %v68_v2  ;;  %vm65_vm1 = vcmp.gt.f32.partialorder %v63_v3, 0.5 }
  0x11   :  { %72 = vst [vmem:[#allocation8] sm:$0xff] %v70_v6  ;;  %v71_v7 = vsel %vm65_vm1, %v67_v4, %v69_v5 }
  0x12   :  { %73 = vst [vmem:[#allocation8 + $0x8] sm:$0xff] %v71_v7 }
  0x13   :  { %86 = dma.vmem_to_hbm [thread:$0]  %s79_s28, 256, %s81_s30, [#allocation4], %s203_s20, %s203_s20, %s204_s21  }
  0x14   :  { %200 = dma.done.wait [#allocation4], 256  }
  0x15   :  { %201 = vsyncadd [#allocation4], 4294967040 }
  0x16   :  { %91 = vsyncpa [#allocation3], 1 }
  0x17   :  { %92 = vsyncpa [#allocation6], 1 }
  0x18   :  { %93 = vsyncpa [#allocation4], 1 }

</bundles_post_ra>
